<compile_context>
chip_gen: v5e
topology: v5e:2x2
jax: 0.10.0
libtpu: 0.0.40
codegen_flags: <defaults>
</compile_context>

<pallas_src>
import jax
import jax.numpy as jnp
from jax import lax
from jax.experimental import pallas as pl
from jax.experimental.pallas import tpu as pltpu


def _round_up(n, m):
    return ((n + m - 1) // m) * m


def value_net_kernel(x_ref, w1t_ref, b1_ref, w2t_ref, b2_ref, o_ref):
    # All math in f32 regardless of the streaming dtype: f32 MXU accumulation,
    # f32 bias + ReLU on the VPU, hidden activations kept f32 for the 2nd dot.
    x = x_ref[...].astype(jnp.float32)                       # (tb, 15)
    h = jnp.dot(x, w1t_ref[...].astype(jnp.float32),
                preferred_element_type=jnp.float32)          # (tb, 50)
    h = jnp.maximum(h + b1_ref[...], 0.0)                    # bias + ReLU
    y = jnp.dot(h, w2t_ref[...].astype(jnp.float32),
                preferred_element_type=jnp.float32)          # (tb, 4)
    o_ref[...] = (y + b2_ref[...]).astype(o_ref.dtype)


def _mlp_reference(x, w1, b1, w2, b2):
    """Plain-XLA forward (also the tiny-batch fast path)."""
    h = jnp.maximum(jnp.dot(x, w1.T, precision=lax.Precision.HIGHEST) + b1, 0.0)
    return jnp.dot(h, w2.T, precision=lax.Precision.HIGHEST) + b2


def value_network_forward(x, w1, b1, w2, b2, *, block_b=8192, stream_dtype=None,
                          min_pallas_batch=512):
    """Forward pass of ValueNetwork.

    x : (B, 15)   w1: (50, 15)  b1: (50,)   w2: (4, 50)  b2: (4,)
    returns (B, 4) float32.   (PyTorch nn.Linear layouts.)

    block_b:        max batch-tile rows.  Default 8192 uses ~20-24 MiB VMEM
                    (lane-padded tiles), safe on v5e/v6e (128 MiB) and v7x
                    (64 MiB).  Larger tiles need a higher vmem_limit_bytes.
    stream_dtype:   e.g. jnp.bfloat16 to stream x / weights narrow (math stays
                    f32).  Only worthwhile if the cast fuses into x's producer
                    or x is already narrow.
    min_pallas_batch: below this, compute with plain jnp (fast path).
    """
    B, in_f = x.shape
    hid, _ = w1.shape          # 50
    out_f, _ = w2.shape        # 4

    b1 = jnp.asarray(b1, jnp.float32).reshape(1, hid)
    b2 = jnp.asarray(b2, jnp.float32).reshape(1, out_f)

    if B < min_pallas_batch:
        # Tiny RL-style batch: kernel launch + 8/128-padded tiles cost more
        # than the whole MLP; let XLA fuse it.
        return _mlp_reference(x, w1, b1, w2, b2)

    if stream_dtype is not None and x.dtype != stream_dtype:
        # NOTE: as a standalone op this cast is an extra HBM round-trip of x.
        x = x.astype(stream_dtype)

    # Tiny weights: pre-transpose once (outside the kernel, ~3 KB) so both dots
    # are standard (m,k)@(k,n); they stay resident in VMEM across the grid.
    w1t = jnp.asarray(w1).T.astype(x.dtype)   # (15, 50)
    w2t = jnp.asarray(w2).T.astype(x.dtype)   # (50, 4)

    # Batch tile: multiple of 8 rows, >= 512 where possible for DMA efficiency,
    # capped by block_b, and for B >= 1024 capped so the grid has >= 2 steps
    # (one per v7x TensorCore).  No padding: the last block is bounded by
    # Pallas, so there is never wasted HBM traffic.
    ROW_QUANT = 512
    tb = min(block_b, _round_up(B, ROW_QUANT))
    if B >= 2 * ROW_QUANT:
        tb = min(tb, _round_up(pl.cdiv(B, 2), ROW_QUANT))
    tb = min(tb, _round_up(B, 8))
    tb = max(8, _round_up(tb, 8))
    grid = (pl.cdiv(B, tb),)

    return pl.pallas_call(
        value_net_kernel,
        out_shape=jax.ShapeDtypeStruct((B, out_f), jnp.float32),
        grid_spec=pltpu.PrefetchScalarGridSpec(
            num_scalar_prefetch=0,
            grid=grid,
            in_specs=[
                pl.BlockSpec((tb, in_f), lambda i: (i, 0)),     # x: streamed rows
                pl.BlockSpec((in_f, hid), lambda i: (0, 0)),    # w1^T: resident
                pl.BlockSpec((1, hid), lambda i: (0, 0)),       # b1: resident
                pl.BlockSpec((hid, out_f), lambda i: (0, 0)),   # w2^T: resident
                pl.BlockSpec((1, out_f), lambda i: (0, 0)),     # b2: resident
            ],
            out_specs=pl.BlockSpec((tb, out_f), lambda i: (i, 0)),
        ),
        compiler_params=pltpu.CompilerParams(
            dimension_semantics=("parallel",),
            vmem_limit_bytes=48 * 1024 * 1024,
        ),
    )(x, w1t, b1, w2t, b2)


def init_params(key):
    """Mirror the PyTorch module: weights ~ Normal(0, 0.1) (as in __init__),
    biases keep nn.Linear's default U(-1/sqrt(fan_in), 1/sqrt(fan_in))."""
    k1, k2, k3, k4 = jax.random.split(key, 4)
    w1 = 0.1 * jax.random.normal(k1, (50, 15), dtype=jnp.float32)
    b1 = jax.random.uniform(k2, (50,), dtype=jnp.float32,
                            minval=-1.0 / jnp.sqrt(15.0), maxval=1.0 / jnp.sqrt(15.0))
    w2 = 0.1 * jax.random.normal(k3, (4, 50), dtype=jnp.float32)
    b2 = jax.random.uniform(k4, (4,), dtype=jnp.float32,
                            minval=-1.0 / jnp.sqrt(50.0), maxval=1.0 / jnp.sqrt(50.0))
    return w1, b1, w2, b2


if __name__ == "__main__":
    key = jax.random.PRNGKey(0)
    kp, k1, k2, k3 = jax.random.split(key, 4)
    w1, b1, w2, b2 = init_params(kp)

    # 1) Pallas path, default tiling: B=1024 -> tb=512, 2 parallel grid steps
    #    (exercises the v7x two-TensorCore split).
    x_big = jax.random.normal(k1, (1024, 15), dtype=jnp.float32)
    out_big = jax.block_until_ready(
        value_network_forward(x_big, w1, b1, w2, b2, min_pallas_batch=0))
    ref_big = _mlp_reference(x_big, w1, b1, w2, b2)
    assert out_big.shape == (1024, 4)
    assert jnp.allclose(out_big, ref_big, atol=1e-4, rtol=1e-4)

    # 2) Pallas path, small tile, non-multiple batch: B=300, tb=128 -> 3 steps,
    #    partial last block handled by bounded DMA (no padding, no relayout).
    x_odd = jax.random.normal(k2, (300, 15), dtype=jnp.float32)
    out_odd = jax.block_until_ready(
        value_network_forward(x_odd, w1, b1, w2, b2, block_b=128, min_pallas_batch=0))
    ref_odd = _mlp_reference(x_odd, w1, b1, w2, b2)
    assert out_odd.shape == (300, 4)
    assert jnp.allclose(out_odd, ref_odd, atol=1e-4, rtol=1e-4)

    # 3) Tiny RL-style batch (B=2): auto fast path, no Pallas launch.
    x_small = jax.random.normal(k3, (2, 15), dtype=jnp.float32)
    out_small = jax.block_until_ready(value_network_forward(x_small, w1, b1, w2, b2))
    ref_small = _mlp_reference(x_small, w1, b1, w2, b2)
    assert out_small.shape == (2, 4)
    assert jnp.allclose(out_small, ref_small, atol=1e-4, rtol=1e-4)

    print("KERNEL_OK")
</pallas_src>

<mosaic_0001>
module attributes {stable_mosaic.version = 11 : i64} {
  func.func @value_net_kernel(%arg0: i32, %arg1: memref<512x15xf32, #tpu.memory_space<vmem>>, %arg2: memref<15x50xf32, #tpu.memory_space<vmem>>, %arg3: memref<1x50xf32, #tpu.memory_space<vmem>>, %arg4: memref<50x4xf32, #tpu.memory_space<vmem>>, %arg5: memref<1x4xf32, #tpu.memory_space<vmem>>, %arg6: memref<512x4xf32, #tpu.memory_space<vmem>>) attributes {dimension_semantics = [#tpu.dimension_semantics<parallel>], iteration_bounds = array<i64: 2>, scalar_prefetch = 0 : i64, scratch_operands = 0 : i64, tpu.core_type = #tpu.core_type<tc>, window_params = [{transform_indices = @transform_0, window_bounds = array<i64: 512, 15>}, {pipeline_mode = #tpu.pipeline_mode<synchronous>, transform_indices = @transform_1, window_bounds = array<i64: 15, 50>}, {pipeline_mode = #tpu.pipeline_mode<synchronous>, transform_indices = @transform_2, window_bounds = array<i64: 1, 50>}, {pipeline_mode = #tpu.pipeline_mode<synchronous>, transform_indices = @transform_3, window_bounds = array<i64: 50, 4>}, {pipeline_mode = #tpu.pipeline_mode<synchronous>, transform_indices = @transform_4, window_bounds = array<i64: 1, 4>}, {transform_indices = @transform_5, window_bounds = array<i64: 512, 4>}]} {
    %c0 = arith.constant 0 : index
    %c0_0 = arith.constant 0 : index
    %0 = vector.load %arg1[%c0, %c0_0] : memref<512x15xf32, #tpu.memory_space<vmem>>, vector<512x15xf32>
    %c0_1 = arith.constant 0 : index
    %c0_2 = arith.constant 0 : index
    %1 = vector.load %arg2[%c0_1, %c0_2] : memref<15x50xf32, #tpu.memory_space<vmem>>, vector<15x50xf32>
    %cst = arith.constant dense<0.000000e+00> : vector<512x50xf32>
    %2 = tpu.matmul %0, %1, %cst {dimension_numbers = #tpu.dot_dimension_numbers<[1], [0], [0], [1], [0, 0, 1, 1], [], []>} : vector<512x15xf32>, vector<15x50xf32>, vector<512x50xf32> -> vector<512x50xf32>
    %c0_3 = arith.constant 0 : index
    %c0_4 = arith.constant 0 : index
    %3 = vector.load %arg3[%c0_3, %c0_4] : memref<1x50xf32, #tpu.memory_space<vmem>>, vector<1x50xf32>
    %4 = vector.broadcast %3 : vector<1x50xf32> to vector<512x50xf32>
    %5 = arith.addf %2, %4 : vector<512x50xf32>
    %cst_5 = arith.constant 0.000000e+00 : f32
    %6 = vector.broadcast %cst_5 : f32 to vector<512x50xf32>
    %7 = arith.maximumf %5, %6 : vector<512x50xf32>
    %c0_6 = arith.constant 0 : index
    %c0_7 = arith.constant 0 : index
    %8 = vector.load %arg4[%c0_6, %c0_7] : memref<50x4xf32, #tpu.memory_space<vmem>>, vector<50x4xf32>
    %cst_8 = arith.constant dense<0.000000e+00> : vector<512x4xf32>
    %9 = tpu.matmul %7, %8, %cst_8 {dimension_numbers = #tpu.dot_dimension_numbers<[1], [0], [0], [1], [0, 0, 1, 1], [], []>} : vector<512x50xf32>, vector<50x4xf32>, vector<512x4xf32> -> vector<512x4xf32>
    %c0_9 = arith.constant 0 : index
    %c0_10 = arith.constant 0 : index
    %10 = vector.load %arg5[%c0_9, %c0_10] : memref<1x4xf32, #tpu.memory_space<vmem>>, vector<1x4xf32>
    %11 = vector.broadcast %10 : vector<1x4xf32> to vector<512x4xf32>
    %12 = arith.addf %9, %11 : vector<512x4xf32>
    %c0_11 = arith.constant 0 : index
    %c0_12 = arith.constant 0 : index
    %13 = vector.load %arg6[%c0_11, %c0_12] : memref<512x4xf32, #tpu.memory_space<vmem>>, vector<512x4xf32>
    tpu.vector_store %arg6[%c0_11, %c0_12], %12 {strides = array<i32>} : memref<512x4xf32, #tpu.memory_space<vmem>>, vector<512x4xf32>,
    return
  }
  func.func @transform_0(%arg0: i32) -> (i32, i32) {
    %c0_i32 = arith.constant 0 : i32
    %c0_i32_0 = arith.constant 0 : i32
    return %arg0, %c0_i32 : i32, i32
  }
  func.func @transform_1(%arg0: i32) -> (i32, i32) {
    %c0_i32 = arith.constant 0 : i32
    %c0_i32_0 = arith.constant 0 : i32
    %c0_i32_1 = arith.constant 0 : i32
    return %c0_i32, %c0_i32_0 : i32, i32
  }
  func.func @transform_2(%arg0: i32) -> (i32, i32) {
    %c0_i32 = arith.constant 0 : i32
    %c0_i32_0 = arith.constant 0 : i32
    %c0_i32_1 = arith.constant 0 : i32
    return %c0_i32, %c0_i32_0 : i32, i32
  }
  func.func @transform_3(%arg0: i32) -> (i32, i32) {
    %c0_i32 = arith.constant 0 : i32
    %c0_i32_0 = arith.constant 0 : i32
    %c0_i32_1 = arith.constant 0 : i32
    return %c0_i32, %c0_i32_0 : i32, i32
  }
  func.func @transform_4(%arg0: i32) -> (i32, i32) {
    %c0_i32 = arith.constant 0 : i32
    %c0_i32_0 = arith.constant 0 : i32
    %c0_i32_1 = arith.constant 0 : i32
    return %c0_i32, %c0_i32_0 : i32, i32
  }
  func.func @transform_5(%arg0: i32) -> (i32, i32) {
    %c0_i32 = arith.constant 0 : i32
    %c0_i32_0 = arith.constant 0 : i32
    return %arg0, %c0_i32 : i32, i32
  }
}

</mosaic_0001>

<bundles_post_ra>
// kernel: tpu_custom_call.1
= control target key start
LH: loop header
LB: loop body
LE: loop exit
PB: predicated region body
PF: predicated region fallthrough
CT: control target
= control target key end

     0   :  { %s1504_s18 = smov 0   ;;  %s2017_s0 = inlined_call_operand.vmem [shape: f32[1024,15], index: 0, kind: input, shape index: {}]   ;;  %s2018_s1 = inlined_call_operand.vmem [shape: f32[15,50], index: 1, kind: input, shape index: {}]   ;;  %s2019_s2 = inlined_call_operand.vmem [shape: f32[1,50], index: 2, kind: input, shape index: {}]   ;;  %s2020_s3 = inlined_call_operand.vmem [shape: f32[50,4], index: 3, kind: input, shape index: {}]   ;;  %s2021_s4 = inlined_call_operand.vmem [shape: f32[1,4], index: 4, kind: input, shape index: {}]   ;;  %s2022_s5 = inlined_call_operand.vmem [shape: f32[1024,4], index: 5, kind: output, shape index: {}]  }
   0x1 LB: > { %s1306_s19 = sadd.s32 4294967295, %s1472_s18   ;;  %p1310_p0 = scmp.ge.s32.totalorder %s1472_s18, 1  ;;  %s1472_s18 = sphi %s1504_s18, %s15_s18  }
   0x2   : > { %p188_p1 = scmp.lt.s32.totalorder %s1472_s18, 3 }
   0x4   : > { %p189_p2 = pnand %p1310_p0, %p188_p1 }
   0x5   : > { %s1311_s24 = sshll.u32 (!%p189_p2), %s1306_s19, 6 }
   0x6   : > { %192 = sbr.rel (%p189_p2) target bundleno = 784 (0x310), region = 40  ;;  %p217_p3 = scmp.lt.s32.totalorder (!%p189_p2), %s1311_s24, 127 }
   0xb   : > { %v293_v0 = vld [vmem:[%s2018_s1 + $0x8] sm:$0x7f]  ;;  %vm491_vm0 = vcmask 1046528   ;;  %v292_v1 = vld [vmem:[%s2018_s1] sm:$0xff]  ;;  %s2024_s24 = smov (!%p217_p3, %s1311_s24), 127  ;;  %vm298_vm1 = vcmask 121856  }
   0xc   : > { %1315 = vmatpush.msk.msra.mxu0 %vm491_vm0, %v293_v0  ;;  %1447 = vmatpush.msk.msra.mxu3 %vm491_vm0, %v293_v0  ;;  %s1312_s25 = sshll.u32 %s2024_s24, 3  ;;  %v774_v13 = vld [vmem:[%s2020_s3 + $0x30] sm:$0x3]  ;;  %vm972_vm2 = vcmask 1041408   ;;  %v773_v14 = vld [vmem:[%s2020_s3 + $0x28] sm:$0xff]  ;;  %v772_v16 = vld [vmem:[%s2020_s3 + $0x20] sm:$0xff] }
   0xd   : > { %s1526_s28 = scalar_lea.vmem %s2017_s0, %s1312_s25  ;;  %1380 = vmatpush.msk.msra.mxu1 %vm972_vm2, %v774_v13  ;;  %1449 = vmatpush.msk.msra.mxu2 %vm972_vm2, %v774_v13  ;;  %v771_v17 = vld [vmem:[%s2020_s3 + $0x18] sm:$0xff]  ;;  %v770_v18 = vld [vmem:[%s2020_s3 + $0x10] sm:$0xff]  ;;  %v769_v20 = vld [vmem:[%s2020_s3 + $0x8] sm:$0xff]  ;;  %vm779_vm3 = vcmask 408576   ;;  %s1670_s27 = scalar_lea.vmem %s2022_s5, %s1312_s25  ;;  %vm1185_vm4 = vcmask 31744  }
   0xe   : > { %510 = vmatpush.msra.mxu0 %v292_v1  ;;  %1448 = vmatpush.msra.mxu3 %v292_v1  ;;  %v228_v2 = vld [vmem:[%s1526_s28] sm:$0xff]  ;;  %v229_v3 = vld [vmem:[%s1526_s28 + $0x8] sm:$0xff]  ;;  %v230_v4 = vld [vmem:[%s1526_s28 + $0x10] sm:$0xff] }
   0xf   : > { %1316 = vmatmul.msk.f32.vlgmr.msra.gmra.mxu0 %vm298_vm1, %v228_v2  ;;  %v231_v5 = vld [vmem:[%s1526_s28 + $0x18] sm:$0xff]  ;;  %v232_v6 = vld [vmem:[%s1526_s28 + $0x20] sm:$0xff]  ;;  %v233_v7 = vld [vmem:[%s1526_s28 + $0x28] sm:$0xff]  ;;  %986 = vmatpush.msra.mxu1 %v773_v14 }
  0x10   : > { %v234_v8 = vld [vmem:[%s1526_s28 + $0x30] sm:$0xff]  ;;  %v235_v9 = vld [vmem:[%s1526_s28 + $0x38] sm:$0xff]  ;;  %v236_v10 = vld [vmem:[%s1526_s28 + $0x40] sm:$0xff]  ;;  %1450 = vmatpush.msra.mxu2 %v773_v14 }
  0x11   : > { %v237_v11 = vld [vmem:[%s1526_s28 + $0x48] sm:$0xff]  ;;  %v238_v12 = vld [vmem:[%s1526_s28 + $0x50] sm:$0xff]  ;;  %v239_v15 = vld [vmem:[%s1526_s28 + $0x58] sm:$0xff]  ;;  %987 = vmatpush.msra.mxu1 %v772_v16 }
  0x12   : > { %1451 = vmatpush.msra.mxu2 %v772_v16  ;;  %v240_v19 = vld [vmem:[%s1526_s28 + $0x60] sm:$0xff]  ;;  %v241_v22 = vld [vmem:[%s1526_s28 + $0x68] sm:$0xff]  ;;  %v242_v23 = vld [vmem:[%s1526_s28 + $0x70] sm:$0xff] }
  0x13   : > { %988 = vmatpush.msra.mxu1 %v771_v17  ;;  %v768_v21 = vld [vmem:[%s2020_s3] sm:$0xff]  ;;  %v243_v24 = vld [vmem:[%s1526_s28 + $0x78] sm:$0xff]  ;;  %v245_v31 = vld [vmem:[%s1526_s28 + $0x88] sm:$0xff] }
  0x14   : > { %1452 = vmatpush.msra.mxu2 %v771_v17  ;;  %v1584_v25 = vld [vmem:[%s2019_s2] ss:$0 sm:$0xff]  ;;  %v246_v35 = vld [vmem:[%s1526_s28 + $0x90] sm:$0xff]  ;;  %v247_v39 = vld [vmem:[%s1526_s28 + $0x98] sm:$0xff] }
  0x15   : > { %989 = vmatpush.msra.mxu1 %v770_v18  ;;  %v244_v27 = vld [vmem:[%s1526_s28 + $0x80] sm:$0xff]  ;;  %v249_v47 = vld [vmem:[%s1526_s28 + $0xa8] sm:$0xff]  ;;  %v250_v51 = vld [vmem:[%s1526_s28 + $0xb0] sm:$0xff] }
  0x16   : > { %1453 = vmatpush.msra.mxu2 %v770_v18  ;;  %v248_v43 = vld [vmem:[%s1526_s28 + $0xa0] sm:$0xff]  ;;  %v251_v55 = vld [vmem:[%s1526_s28 + $0xb8] sm:$0xff]  ;;  %v253_v63 = vld [vmem:[%s1526_s28 + $0xc8] sm:$0xff] }
  0x17   : > { %1317 = vmatmul.msk.f32.gmra.mxu0 %vm298_vm1, %v229_v3  ;;  %990 = vmatpush.msra.mxu1 %v769_v20  ;;  %v252_v59 = vld [vmem:[%s1526_s28 + $0xc0] sm:$0xff]  ;;  %v254_v3 = vld [vmem:[%s1526_s28 + $0xd0] sm:$0xff]  ;;  %v261_v14 = vld [vmem:[%s1526_s28 + $0x108] sm:$0xff] }
  0x18   : > { %1454 = vmatpush.msra.mxu2 %v769_v20  ;;  %1349 = vmatmul.msk.f32.vlgmr.msra.gmra.mxu3 %vm298_vm1, %v261_v14  ;;  %v257_v16 = vld [vmem:[%s1526_s28 + $0xe8] sm:$0xff] }
  0x19   : > { %991 = vmatpush.msra.mxu1 %v768_v21 }
  0x1a   : > { %1455 = vmatpush.msra.mxu2 %v768_v21  ;;  %v258_v21 = vld [vmem:[%s1526_s28 + $0xf0] sm:$0xff] }
  0x1f   : > { %1318 = vmatmul.msk.f32.gmra.mxu0 %vm298_vm1, %v230_v4 }
  0x27   : > { %1319 = vmatmul.msk.f32.gmra.mxu0 %vm298_vm1, %v231_v5 }
  0x2f   : > { %1320 = vmatmul.msk.f32.gmra.mxu0 %vm298_vm1, %v232_v6 }
  0x37   : > { %1321 = vmatmul.msk.f32.gmra.mxu0 %vm298_vm1, %v233_v7  ;;  %v255_v7 = vld [vmem:[%s1526_s28 + $0xd8] sm:$0xff] }
  0x3f   : > { %1322 = vmatmul.msk.f32.gmra.mxu0 %vm298_vm1, %v234_v8 }
  0x47   : > { %1323 = vmatmul.msk.f32.gmra.mxu0 %vm298_vm1, %v235_v9 }
  0x4f   : > { %1324 = vmatmul.msk.f32.gmra.mxu0 %vm298_vm1, %v236_v10 }
  0x57   : > { %1325 = vmatmul.msk.f32.gmra.mxu0 %vm298_vm1, %v237_v11  ;;  %v256_v11 = vld [vmem:[%s1526_s28 + $0xe0] sm:$0xff] }
  0x5f   : > { %1326 = vmatmul.msk.f32.gmra.mxu0 %vm298_vm1, %v238_v12 }
  0x67   : > { %1327 = vmatmul.msk.f32.gmra.mxu0 %vm298_vm1, %v239_v15 }
  0x6f   : > { %1328 = vmatmul.msk.f32.gmra.mxu0 %vm298_vm1, %v240_v19  ;;  %v262_v19 = vld [vmem:[%s1526_s28 + $0x110] sm:$0xff] }
  0x70   : > { %1350 = vmatmul.msk.f32.gmra.mxu3 %vm298_vm1, %v262_v19 }
  0x77   : > { %1329 = vmatmul.msk.f32.gmra.mxu0 %vm298_vm1, %v241_v22 }
  0x7f   : > { %1330 = vmatmul.msk.f32.gmra.mxu0 %vm298_vm1, %v242_v23 }
  0x87   : > { %1331 = vmatmul.msk.f32.gmra.mxu0 %vm298_vm1, %v243_v24  ;;  %v263_v24 = vld [vmem:[%s1526_s28 + $0x118] sm:$0xff] }
  0x88   : > { %1351 = vmatmul.msk.f32.gmra.mxu3 %vm298_vm1, %v263_v24 }
  0x8c   : > { %v512_v26 = vpop.f32.mrf.mxu0 }
  0x8d   : > { %v513_v28 = vadd.f32 %v1584_v25, %v512_v26 }
  0x8f   : > { %v704_v29 = vmax.f32 %v513_v28, 0.0  ;;  %1332 = vmatmul.msk.f32.gmra.mxu0 %vm298_vm1, %v244_v27  ;;  %v259_v27 = vld [vmem:[%s1526_s28 + $0xf8] sm:$0xff] }
  0x91   : > { %1381 = vmatmul.msk.f32.vlgmr.msra.gmra.mxu1 %vm779_vm3, %v704_v29 }
  0x94   : > { %v515_v30 = vpop.f32.mrf.mxu0 }
  0x95   : > { %v516_v32 = vadd.f32 %v1584_v25, %v515_v30  ;;  %v264_v30 = vld [vmem:[%s1526_s28 + $0x120] sm:$0xff] }
  0x96   : > { %1352 = vmatmul.msk.f32.gmra.mxu3 %vm298_vm1, %v264_v30 }
  0x97   : > { %v705_v33 = vmax.f32 %v516_v32, 0.0  ;;  %1333 = vmatmul.msk.f32.gmra.mxu0 %vm298_vm1, %v245_v31  ;;  %v1661_v31 = vld [vmem:[%s2021_s4] ss:$0 sm:$0xff] }
  0x99   : > { %1382 = vmatmul.msk.f32.gmra.mxu1 %vm779_vm3, %v705_v33  ;;  %v260_v33 = vld [vmem:[%s1526_s28 + $0x100] sm:$0xff] }
  0x9c   : > { %v518_v34 = vpop.f32.mrf.mxu0 }
  0x9d   : > { %v519_v36 = vadd.f32 %v1584_v25, %v518_v34 }
  0x9f   : > { %v706_v37 = vmax.f32 %v519_v36, 0.0  ;;  %1334 = vmatmul.msk.f32.gmra.mxu0 %vm298_vm1, %v246_v35 }
  0xa1   : > { %1383 = vmatmul.msk.f32.gmra.mxu1 %vm779_vm3, %v706_v37 }
  0xa4   : > { %v521_v38 = vpop.f32.mrf.mxu0 }
  0xa5   : > { %v522_v40 = vadd.f32 %v1584_v25, %v521_v38  ;;  %v265_v38 = vld [vmem:[%s1526_s28 + $0x128] sm:$0xff] }
  0xa6   : > { %1353 = vmatmul.msk.f32.gmra.mxu3 %vm298_vm1, %v265_v38 }
  0xa7   : > { %v707_v41 = vmax.f32 %v522_v40, 0.0  ;;  %1335 = vmatmul.msk.f32.gmra.mxu0 %vm298_vm1, %v247_v39 }
  0xa9   : > { %1384 = vmatmul.msk.f32.gmra.mxu1 %vm779_vm3, %v707_v41 }
  0xac   : > { %v524_v42 = vpop.f32.mrf.mxu0 }
  0xad   : > { %v525_v44 = vadd.f32 %v1584_v25, %v524_v42 }
  0xaf   : > { %v708_v45 = vmax.f32 %v525_v44, 0.0  ;;  %1336 = vmatmul.msk.f32.gmra.mxu0 %vm298_vm1, %v248_v43  ;;  %v266_v44 = vld [vmem:[%s1526_s28 + $0x130] sm:$0xff] }
  0xb0   : > { %1354 = vmatmul.msk.f32.gmra.mxu3 %vm298_vm1, %v266_v44 }
  0xb1   : > { %1385 = vmatmul.msk.f32.gmra.mxu1 %vm779_vm3, %v708_v45 }
  0xb4   : > { %v527_v46 = vpop.f32.mrf.mxu0 }
  0xb5   : > { %v528_v48 = vadd.f32 %v1584_v25, %v527_v46 }
  0xb7   : > { %v709_v49 = vmax.f32 %v528_v48, 0.0  ;;  %1337 = vmatmul.msk.f32.gmra.mxu0 %vm298_vm1, %v249_v47 }
  0xb9   : > { %1386 = vmatmul.msk.f32.gmra.mxu1 %vm779_vm3, %v709_v49 }
  0xbc   : > { %v530_v50 = vpop.f32.mrf.mxu0 }
  0xbd   : > { %v531_v52 = vadd.f32 %v1584_v25, %v530_v50  ;;  %v267_v50 = vld [vmem:[%s1526_s28 + $0x138] sm:$0xff] }
  0xbe   : > { %1355 = vmatmul.msk.f32.gmra.mxu3 %vm298_vm1, %v267_v50  ;;  %v611_v50 = vpop.f32.mrf.mxu3 }
  0xbf   : > { %v710_v53 = vmax.f32 %v531_v52, 0.0  ;;  %1338 = vmatmul.msk.f32.gmra.mxu0 %vm298_vm1, %v250_v51 }
  0xc1   : > { %1387 = vmatmul.msk.f32.gmra.mxu1 %vm779_vm3, %v710_v53 }
  0xc4   : > { %v533_v54 = vpop.f32.mrf.mxu0 }
  0xc5   : > { %v534_v56 = vadd.f32 %v1584_v25, %v533_v54 }
  0xc7   : > { %v711_v57 = vmax.f32 %v534_v56, 0.0  ;;  %1339 = vmatmul.msk.f32.gmra.mxu0 %vm298_vm1, %v251_v55  ;;  %v268_v56 = vld [vmem:[%s1526_s28 + $0x140] sm:$0xff] }
  0xc8   : > { %1356 = vmatmul.msk.f32.gmra.mxu3 %vm298_vm1, %v268_v56 }
  0xc9   : > { %1388 = vmatmul.msk.f32.gmra.mxu1 %vm779_vm3, %v711_v57 }
  0xcc   : > { %v536_v58 = vpop.f32.mrf.mxu0 }
  0xcd   : > { %v537_v60 = vadd.f32 %v1584_v25, %v536_v58 }
  0xcf   : > { %v712_v61 = vmax.f32 %v537_v60, 0.0  ;;  %1340 = vmatmul.msk.f32.gmra.mxu0 %vm298_vm1, %v252_v59 }
  0xd1   : > { %1389 = vmatmul.msk.f32.gmra.mxu1 %vm779_vm3, %v712_v61 }
  0xd4   : > { %v539_v62 = vpop.f32.mrf.mxu0 }
  0xd5   : > { %v540_v0 = vadd.f32 %v1584_v25, %v539_v62  ;;  %v269_v62 = vld [vmem:[%s1526_s28 + $0x148] sm:$0xff] }
  0xd6   : > { %1357 = vmatmul.msk.f32.gmra.mxu3 %vm298_vm1, %v269_v62  ;;  %v279_v62 = vld [vmem:[%s1526_s28 + $0x198] sm:$0xff] }
  0xd7   : > { %v713_v1 = vmax.f32 %v540_v0, 0.0  ;;  %1341 = vmatmul.msk.f32.gmra.mxu0 %vm298_vm1, %v253_v63 }
  0xd9   : > { %1390 = vmatmul.msk.f32.gmra.mxu1 %vm779_vm3, %v713_v1 }
  0xdc   : > { %v542_v2 = vpop.f32.mrf.mxu0 }
  0xdd   : > { %v543_v4 = vadd.f32 %v1584_v25, %v542_v2 }
  0xdf   : > { %v714_v5 = vmax.f32 %v543_v4, 0.0  ;;  %1342 = vmatmul.msk.f32.gmra.mxu0 %vm298_vm1, %v254_v3  ;;  %v270_v4 = vld [vmem:[%s1526_s28 + $0x150] sm:$0xff] }
  0xe0   : > { %1358 = vmatmul.msk.f32.gmra.mxu3 %vm298_vm1, %v270_v4 }
  0xe1   : > { %1391 = vmatmul.msk.f32.gmra.mxu1 %vm779_vm3, %v714_v5 }
  0xe4   : > { %v545_v6 = vpop.f32.mrf.mxu0 }
  0xe5   : > { %v546_v8 = vadd.f32 %v1584_v25, %v545_v6 }
  0xe7   : > { %v715_v9 = vmax.f32 %v546_v8, 0.0  ;;  %1343 = vmatmul.msk.f32.gmra.mxu0 %vm298_vm1, %v255_v7 }
  0xe9   : > { %1392 = vmatmul.msk.f32.gmra.mxu1 %vm779_vm3, %v715_v9 }
  0xec   : > { %v548_v10 = vpop.f32.mrf.mxu0 }
  0xed   : > { %v549_v12 = vadd.f32 %v1584_v25, %v548_v10  ;;  %v271_v10 = vld [vmem:[%s1526_s28 + $0x158] sm:$0xff] }
  0xee   : > { %1359 = vmatmul.msk.f32.gmra.mxu3 %vm298_vm1, %v271_v10 }
  0xef   : > { %v716_v13 = vmax.f32 %v549_v12, 0.0  ;;  %1344 = vmatmul.msk.f32.gmra.mxu0 %vm298_vm1, %v256_v11 }
  0xf1   : > { %1393 = vmatmul.msk.f32.gmra.mxu1 %vm779_vm3, %v716_v13 }
  0xf4   : > { %v551_v15 = vpop.f32.mrf.mxu0 }
  0xf5   : > { %v552_v17 = vadd.f32 %v1584_v25, %v551_v15 }
  0xf7   : > { %v717_v18 = vmax.f32 %v552_v17, 0.0  ;;  %1345 = vmatmul.msk.f32.gmra.mxu0 %vm298_vm1, %v257_v16  ;;  %v272_v16 = vld [vmem:[%s1526_s28 + $0x160] sm:$0xff] }
  0xf8   : > { %1360 = vmatmul.msk.f32.gmra.mxu3 %vm298_vm1, %v272_v16 }
  0xf9   : > { %1394 = vmatmul.msk.f32.gmra.mxu1 %vm779_vm3, %v717_v18 }
  0xfc   : > { %v554_v20 = vpop.f32.mrf.mxu0 }
  0xfd   : > { %v555_v22 = vadd.f32 %v1584_v25, %v554_v20 }
  0xff   : > { %v718_v23 = vmax.f32 %v555_v22, 0.0  ;;  %1346 = vmatmul.msk.f32.gmra.mxu0 %vm298_vm1, %v258_v21  ;;  %v273_v22 = vld [vmem:[%s1526_s28 + $0x168] sm:$0xff] }
 0x100   : > { %1361 = vmatmul.msk.f32.gmra.mxu3 %vm298_vm1, %v273_v22 }
 0x101   : > { %1395 = vmatmul.msk.f32.gmra.mxu1 %vm779_vm3, %v718_v23 }
 0x104   : > { %v557_v26 = vpop.f32.mrf.mxu0 }
 0x105   : > { %v558_v28 = vadd.f32 %v1584_v25, %v557_v26 }
 0x107   : > { %v719_v29 = vmax.f32 %v558_v28, 0.0  ;;  %1347 = vmatmul.msk.f32.gmra.mxu0 %vm298_vm1, %v259_v27 }
 0x109   : > { %1396 = vmatmul.msk.f32.gmra.mxu1 %vm779_vm3, %v719_v29  ;;  %v274_v29 = vld [vmem:[%s1526_s28 + $0x170] sm:$0xff] }
 0x10a   : > { %1362 = vmatmul.msk.f32.gmra.mxu3 %vm298_vm1, %v274_v29 }
 0x10c   : > { %v560_v32 = vpop.f32.mrf.mxu0 }
 0x10d   : > { %v561_v34 = vadd.f32 %v1584_v25, %v560_v32 }
 0x10e   : > { %v993_v35 = vpop.f32.mrf.mxu1 }
 0x10f   : > { %v720_v36 = vmax.f32 %v561_v34, 0.0  ;;  %v994_v37 = vadd.f32 %v1661_v31, %v993_v35  ;;  %1348 = vmatmul.msk.f32.gmra.mxu0 %vm298_vm1, %v260_v33 }
 0x111   : > { %1186 = vst.msk [vmem:[%s1670_s27] sm:$0xff] %vm1185_vm4, %v994_v37  ;;  %1397 = vmatmul.msk.f32.gmra.mxu1 %vm779_vm3, %v720_v36  ;;  %v275_v36 = vld [vmem:[%s1526_s28 + $0x178] sm:$0xff] }
 0x112   : > { %1363 = vmatmul.msk.f32.gmra.mxu3 %vm298_vm1, %v275_v36 }
 0x114   : > { %v563_v39 = vpop.f32.mrf.mxu0 }
 0x115   : > { %v564_v40 = vadd.f32 %v1584_v25, %v563_v39 }
 0x116   : > { %v996_v41 = vpop.f32.mrf.mxu1 }
 0x117   : > { %v721_v42 = vmax.f32 %v564_v40, 0.0  ;;  %v997_v43 = vadd.f32 %v1661_v31, %v996_v41 }
 0x119   : > { %1187 = vst.msk [vmem:[%s1670_s27 + $0x8] sm:$0xff] %vm1185_vm4, %v997_v43  ;;  %1398 = vmatmul.msk.f32.gmra.mxu1 %vm779_vm3, %v721_v42  ;;  %v276_v42 = vld [vmem:[%s1526_s28 + $0x180] sm:$0xff] }
 0x11a   : > { %1364 = vmatmul.msk.f32.gmra.mxu3 %vm298_vm1, %v276_v42 }
 0x11c   : > { %v566_v45 = vpop.f32.mrf.mxu0 }
 0x11d   : > { %v567_v46 = vadd.f32 %v1584_v25, %v566_v45 }
 0x11e   : > { %v999_v47 = vpop.f32.mrf.mxu1 }
 0x11f   : > { %v722_v48 = vmax.f32 %v567_v46, 0.0  ;;  %v1000_v49 = vadd.f32 %v1661_v31, %v999_v47 }
 0x121   : > { %1188 = vst.msk [vmem:[%s1670_s27 + $0x10] sm:$0xff] %vm1185_vm4, %v1000_v49  ;;  %1399 = vmatmul.msk.f32.gmra.mxu1 %vm779_vm3, %v722_v48  ;;  %v277_v48 = vld [vmem:[%s1526_s28 + $0x188] sm:$0xff] }
 0x122   : > { %1365 = vmatmul.msk.f32.gmra.mxu3 %vm298_vm1, %v277_v48 }
 0x124   : > { %v569_v51 = vpop.f32.mrf.mxu0 }
 0x125   : > { %v570_v52 = vadd.f32 %v1584_v25, %v569_v51 }
 0x126   : > { %v1002_v53 = vpop.f32.mrf.mxu1 }
 0x127   : > { %v723_v54 = vmax.f32 %v570_v52, 0.0  ;;  %v1003_v55 = vadd.f32 %v1661_v31, %v1002_v53 }
 0x129   : > { %1189 = vst.msk [vmem:[%s1670_s27 + $0x18] sm:$0xff] %vm1185_vm4, %v1003_v55  ;;  %1400 = vmatmul.msk.f32.gmra.mxu1 %vm779_vm3, %v723_v54  ;;  %v278_v55 = vld [vmem:[%s1526_s28 + $0x190] sm:$0xff] }
 0x12a   : > { %1366 = vmatmul.msk.f32.gmra.mxu3 %vm298_vm1, %v278_v55 }
 0x12c   : > { %v572_v57 = vpop.f32.mrf.mxu0 }
 0x12d   : > { %v573_v58 = vadd.f32 %v1584_v25, %v572_v57  ;;  %v614_v57 = vpop.f32.mrf.mxu3 }
 0x12e   : > { %v1005_v59 = vpop.f32.mrf.mxu1 }
 0x12f   : > { %v724_v60 = vmax.f32 %v573_v58, 0.0  ;;  %v1006_v61 = vadd.f32 %v1661_v31, %v1005_v59 }
 0x131   : > { %1190 = vst.msk [vmem:[%s1670_s27 + $0x20] sm:$0xff] %vm1185_vm4, %v1006_v61  ;;  %1401 = vmatmul.msk.f32.gmra.mxu1 %vm779_vm3, %v724_v60 }
 0x132   : > { %1367 = vmatmul.msk.f32.gmra.mxu3 %vm298_vm1, %v279_v62  ;;  %v289_v62 = vld [vmem:[%s1526_s28 + $0x1e8] sm:$0xff] }
 0x134   : > { %v575_v63 = vpop.f32.mrf.mxu0 }
 0x135   : > { %v576_v0 = vadd.f32 %v1584_v25, %v575_v63 }
 0x136   : > { %v1008_v1 = vpop.f32.mrf.mxu1 }
 0x137   : > { %v725_v2 = vmax.f32 %v576_v0, 0.0  ;;  %v1009_v3 = vadd.f32 %v1661_v31, %v1008_v1  ;;  %v617_v0 = vpop.f32.mrf.mxu3 }
 0x139   : > { %1191 = vst.msk [vmem:[%s1670_s27 + $0x28] sm:$0xff] %vm1185_vm4, %v1009_v3  ;;  %1402 = vmatmul.msk.f32.gmra.mxu1 %vm779_vm3, %v725_v2 }
 0x13c   : > { %v578_v5 = vpop.f32.mrf.mxu0 }
 0x13d   : > { %v579_v6 = vadd.f32 %v1584_v25, %v578_v5  ;;  %v280_v5 = vld [vmem:[%s1526_s28 + $0x1a0] sm:$0xff] }
 0x13e   : > { %v1011_v7 = vpop.f32.mrf.mxu1  ;;  %1368 = vmatmul.msk.f32.gmra.mxu3 %vm298_vm1, %v280_v5 }
 0x13f   : > { %v726_v8 = vmax.f32 %v579_v6, 0.0  ;;  %v1012_v9 = vadd.f32 %v1661_v31, %v1011_v7  ;;  %v620_v7 = vpop.f32.mrf.mxu3 }
 0x141   : > { %1192 = vst.msk [vmem:[%s1670_s27 + $0x30] sm:$0xff] %vm1185_vm4, %v1012_v9  ;;  %1403 = vmatmul.msk.f32.gmra.mxu1 %vm779_vm3, %v726_v8 }
 0x144   : > { %v581_v11 = vpop.f32.mrf.mxu0 }
 0x145   : > { %v582_v12 = vadd.f32 %v1584_v25, %v581_v11 }
 0x146   : > { %v1014_v13 = vpop.f32.mrf.mxu1 }
 0x147   : > { %v727_v14 = vmax.f32 %v582_v12, 0.0  ;;  %v1015_v15 = vadd.f32 %v1661_v31, %v1014_v13  ;;  %v281_v12 = vld [vmem:[%s1526_s28 + $0x1a8] sm:$0xff]  ;;  %v612_v13 = vadd.f32 %v1584_v25, %v611_v50  ;;  %v287_v50 = vld [vmem:[%s1526_s28 + $0x1d8] sm:$0xff] }
 0x148   : > { %1369 = vmatmul.msk.f32.gmra.mxu3 %vm298_vm1, %v281_v12 }
 0x149   : > { %1193 = vst.msk [vmem:[%s1670_s27 + $0x38] sm:$0xff] %vm1185_vm4, %v1015_v15  ;;  %1404 = vmatmul.msk.f32.gmra.mxu1 %vm779_vm3, %v727_v14  ;;  %v623_v14 = vpop.f32.mrf.mxu3  ;;  %v737_v15 = vmax.f32 %v612_v13, 0.0 }
 0x14c   : > { %v584_v17 = vpop.f32.mrf.mxu0 }
 0x14d   : > { %v585_v18 = vadd.f32 %v1584_v25, %v584_v17 }
 0x14e   : > { %v1017_v19 = vpop.f32.mrf.mxu1 }
 0x14f   : > { %v728_v20 = vmax.f32 %v585_v18, 0.0  ;;  %v1018_v21 = vadd.f32 %v1661_v31, %v1017_v19  ;;  %v282_v18 = vld [vmem:[%s1526_s28 + $0x1b0] sm:$0xff]  ;;  %v615_v19 = vadd.f32 %v1584_v25, %v614_v57 }
 0x150   : > { %1370 = vmatmul.msk.f32.gmra.mxu3 %vm298_vm1, %v282_v18 }
 0x151   : > { %1194 = vst.msk [vmem:[%s1670_s27 + $0x40] sm:$0xff] %vm1185_vm4, %v1018_v21  ;;  %1405 = vmatmul.msk.f32.gmra.mxu1 %vm779_vm3, %v728_v20  ;;  %v626_v20 = vpop.f32.mrf.mxu3  ;;  %v738_v21 = vmax.f32 %v615_v19, 0.0 }
 0x154   : > { %v587_v23 = vpop.f32.mrf.mxu0 }
 0x155   : > { %v588_v24 = vadd.f32 %v1584_v25, %v587_v23 }
 0x156   : > { %v1020_v26 = vpop.f32.mrf.mxu1 }
 0x157   : > { %v729_v27 = vmax.f32 %v588_v24, 0.0  ;;  %v1021_v28 = vadd.f32 %v1661_v31, %v1020_v26  ;;  %v283_v24 = vld [vmem:[%s1526_s28 + $0x1b8] sm:$0xff]  ;;  %v618_v26 = vadd.f32 %v1584_v25, %v617_v0 }
 0x158   : > { %1371 = vmatmul.msk.f32.gmra.mxu3 %vm298_vm1, %v283_v24 }
 0x159   : > { %1195 = vst.msk [vmem:[%s1670_s27 + $0x48] sm:$0xff] %vm1185_vm4, %v1021_v28  ;;  %1406 = vmatmul.msk.f32.gmra.mxu1 %vm779_vm3, %v729_v27  ;;  %v629_v27 = vpop.f32.mrf.mxu3  ;;  %v739_v28 = vmax.f32 %v618_v26, 0.0 }
 0x15c   : > { %v590_v30 = vpop.f32.mrf.mxu0 }
 0x15d   : > { %v591_v32 = vadd.f32 %v1584_v25, %v590_v30 }
 0x15e   : > { %v1023_v33 = vpop.f32.mrf.mxu1 }
 0x15f   : > { %v730_v34 = vmax.f32 %v591_v32, 0.0  ;;  %v1024_v35 = vadd.f32 %v1661_v31, %v1023_v33  ;;  %v284_v32 = vld [vmem:[%s1526_s28 + $0x1c0] sm:$0xff]  ;;  %v621_v33 = vadd.f32 %v1584_v25, %v620_v7 }
 0x160   : > { %1372 = vmatmul.msk.f32.gmra.mxu3 %vm298_vm1, %v284_v32 }
 0x161   : > { %1196 = vst.msk [vmem:[%s1670_s27 + $0x50] sm:$0xff] %vm1185_vm4, %v1024_v35  ;;  %1407 = vmatmul.msk.f32.gmra.mxu1 %vm779_vm3, %v730_v34  ;;  %v632_v34 = vpop.f32.mrf.mxu3  ;;  %v740_v35 = vmax.f32 %v621_v33, 0.0 }
 0x162   : > { %v633_v57 = vadd.f32 %v1584_v25, %v632_v34 }
 0x164   : > { %v593_v37 = vpop.f32.mrf.mxu0 }
 0x165   : > { %v594_v38 = vadd.f32 %v1584_v25, %v593_v37 }
 0x166   : > { %v1026_v39 = vpop.f32.mrf.mxu1 }
 0x167   : > { %v731_v40 = vmax.f32 %v594_v38, 0.0  ;;  %v1027_v41 = vadd.f32 %v1661_v31, %v1026_v39  ;;  %v285_v38 = vld [vmem:[%s1526_s28 + $0x1c8] sm:$0xff]  ;;  %v624_v39 = vadd.f32 %v1584_v25, %v623_v14 }
 0x168   : > { %1373 = vmatmul.msk.f32.gmra.mxu3 %vm298_vm1, %v285_v38 }
 0x169   : > { %1197 = vst.msk [vmem:[%s1670_s27 + $0x58] sm:$0xff] %vm1185_vm4, %v1027_v41  ;;  %1408 = vmatmul.msk.f32.gmra.mxu1 %vm779_vm3, %v731_v40  ;;  %v635_v40 = vpop.f32.mrf.mxu3  ;;  %v741_v41 = vmax.f32 %v624_v39, 0.0 }
 0x16c   : > { %v596_v43 = vpop.f32.mrf.mxu0 }
 0x16d   : > { %v597_v44 = vadd.f32 %v1584_v25, %v596_v43 }
 0x16e   : > { %v1029_v45 = vpop.f32.mrf.mxu1 }
 0x16f   : > { %v732_v46 = vmax.f32 %v597_v44, 0.0  ;;  %v1030_v47 = vadd.f32 %v1661_v31, %v1029_v45  ;;  %v286_v44 = vld [vmem:[%s1526_s28 + $0x1d0] sm:$0xff]  ;;  %v627_v45 = vadd.f32 %v1584_v25, %v626_v20 }
 0x170   : > { %1374 = vmatmul.msk.f32.gmra.mxu3 %vm298_vm1, %v286_v44 }
 0x171   : > { %1198 = vst.msk [vmem:[%s1670_s27 + $0x60] sm:$0xff] %vm1185_vm4, %v1030_v47  ;;  %1409 = vmatmul.msk.f32.gmra.mxu1 %vm779_vm3, %v732_v46  ;;  %v638_v46 = vpop.f32.mrf.mxu3  ;;  %v742_v47 = vmax.f32 %v627_v45, 0.0 }
 0x172   : > { %v639_v5 = vadd.f32 %v1584_v25, %v638_v46 }
 0x174   : > { %v599_v49 = vpop.f32.mrf.mxu0  ;;  %v746_v7 = vmax.f32 %v639_v5, 0.0 }
 0x175   : > { %v600_v51 = vadd.f32 %v1584_v25, %v599_v49 }
 0x176   : > { %v1032_v52 = vpop.f32.mrf.mxu1 }
 0x177   : > { %v733_v53 = vmax.f32 %v600_v51, 0.0  ;;  %v1033_v54 = vadd.f32 %v1661_v31, %v1032_v52  ;;  %v630_v51 = vadd.f32 %v1584_v25, %v629_v27 }
 0x178   : > { %1375 = vmatmul.msk.f32.gmra.mxu3 %vm298_vm1, %v287_v50 }
 0x179   : > { %1199 = vst.msk [vmem:[%s1670_s27 + $0x68] sm:$0xff] %vm1185_vm4, %v1033_v54  ;;  %1410 = vmatmul.msk.f32.gmra.mxu1 %vm779_vm3, %v733_v53  ;;  %v641_v52 = vpop.f32.mrf.mxu3  ;;  %v743_v53 = vmax.f32 %v630_v51, 0.0 }
 0x17c   : > { %v602_v56 = vpop.f32.mrf.mxu0 }
 0x17d   : > { %v603_v58 = vadd.f32 %v1584_v25, %v602_v56  ;;  %v288_v56 = vld [vmem:[%s1526_s28 + $0x1e0] sm:$0xff] }
 0x17e   : > { %v1035_v59 = vpop.f32.mrf.mxu1 }
 0x17f   : > { %v734_v60 = vmax.f32 %v603_v58, 0.0  ;;  %v1036_v61 = vadd.f32 %v1661_v31, %v1035_v59  ;;  %v744_v59 = vmax.f32 %v633_v57, 0.0 }
 0x180   : > { %1376 = vmatmul.msk.f32.gmra.mxu3 %vm298_vm1, %v288_v56 }
 0x181   : > { %1200 = vst.msk [vmem:[%s1670_s27 + $0x70] sm:$0xff] %vm1185_vm4, %v1036_v61  ;;  %1411 = vmatmul.msk.f32.gmra.mxu1 %vm779_vm3, %v734_v60  ;;  %v644_v58 = vpop.f32.mrf.mxu3 }
 0x184   : > { %v605_v63 = vpop.f32.mrf.mxu0 }
 0x185   : > { %v606_v1 = vadd.f32 %v1584_v25, %v605_v63  ;;  %v636_v63 = vadd.f32 %v1584_v25, %v635_v40 }
 0x186   : > { %v1038_v2 = vpop.f32.mrf.mxu1 }
 0x187   : > { %v735_v3 = vmax.f32 %v606_v1, 0.0  ;;  %v1039_v4 = vadd.f32 %v1661_v31, %v1038_v2  ;;  %v745_v1 = vmax.f32 %v636_v63, 0.0 }
 0x188   : > { %1377 = vmatmul.msk.f32.gmra.mxu3 %vm298_vm1, %v289_v62 }
 0x189   : > { %1201 = vst.msk [vmem:[%s1670_s27 + $0x78] sm:$0xff] %vm1185_vm4, %v1039_v4  ;;  %1412 = vmatmul.msk.f32.gmra.mxu1 %vm779_vm3, %v735_v3  ;;  %v647_v0 = vpop.f32.mrf.mxu3  ;;  %v290_v4 = vld [vmem:[%s1526_s28 + $0x1f0] sm:$0xff] }
 0x18c   : > { %v608_v6 = vpop.f32.mrf.mxu0 }
 0x18d   : > { %v609_v8 = vadd.f32 %v1584_v25, %v608_v6 }
 0x18e   : > { %v1041_v9 = vpop.f32.mrf.mxu1 }
 0x18f   : > { %v736_v10 = vmax.f32 %v609_v8, 0.0  ;;  %v1042_v11 = vadd.f32 %v1661_v31, %v1041_v9 }
 0x190   : > { %1378 = vmatmul.msk.f32.gmra.mxu3 %vm298_vm1, %v290_v4 }
 0x191   : > { %1202 = vst.msk [vmem:[%s1670_s27 + $0x80] sm:$0xff] %vm1185_vm4, %v1042_v11  ;;  %1413 = vmatmul.msk.f32.vlgmr.msra.gmra.mxu2 %vm779_vm3, %v736_v10  ;;  %v650_v6 = vpop.f32.mrf.mxu3  ;;  %v291_v10 = vld [vmem:[%s1526_s28 + $0x1f8] sm:$0xff]  ;;  %v642_v11 = vadd.f32 %v1584_v25, %v641_v52 }
 0x192   : > { %v651_v27 = vadd.f32 %v1584_v25, %v650_v6 }
 0x193   : > { %v747_v13 = vmax.f32 %v642_v11, 0.0 }
 0x196   : > { %v1044_v16 = vpop.f32.mrf.mxu1 }
 0x197   : > { %v1045_v17 = vadd.f32 %v1661_v31, %v1044_v16  ;;  %v645_v16 = vadd.f32 %v1584_v25, %v644_v58 }
 0x198   : > { %1379 = vmatmul.msk.f32.gmra.mxu3 %vm298_vm1, %v291_v10 }
 0x199   : > { %1203 = vst.msk [vmem:[%s1670_s27 + $0x88] sm:$0xff] %vm1185_vm4, %v1045_v17  ;;  %1414 = vmatmul.msk.f32.gmra.mxu2 %vm779_vm3, %v737_v15  ;;  %v653_v12 = vpop.f32.mrf.mxu3  ;;  %v748_v18 = vmax.f32 %v645_v16, 0.0 }
 0x19a   : > { %v654_v33 = vadd.f32 %v1584_v25, %v653_v12 }
 0x19c   : > { %v751_v34 = vmax.f32 %v654_v33, 0.0 }
 0x19e   : > { %v1047_v22 = vpop.f32.mrf.mxu1 }
 0x19f   : > { %v1048_v23 = vadd.f32 %v1661_v31, %v1047_v22 }
 0x1a1   : > { %1204 = vst.msk [vmem:[%s1670_s27 + $0x90] sm:$0xff] %vm1185_vm4, %v1048_v23  ;;  %1415 = vmatmul.msk.f32.gmra.mxu2 %vm779_vm3, %v738_v21  ;;  %v656_v17 = vpop.f32.mrf.mxu3  ;;  %v648_v21 = vadd.f32 %v1584_v25, %v647_v0 }
 0x1a2   : > { %v657_v38 = vadd.f32 %v1584_v25, %v656_v17 }
 0x1a3   : > { %v749_v23 = vmax.f32 %v648_v21, 0.0 }
 0x1a4   : > { %v752_v39 = vmax.f32 %v657_v38, 0.0 }
 0x1a6   : > { %v1050_v29 = vpop.f32.mrf.mxu1 }
 0x1a7   : > { %v1051_v30 = vadd.f32 %v1661_v31, %v1050_v29  ;;  %v750_v29 = vmax.f32 %v651_v27, 0.0 }
 0x1a9   : > { %1205 = vst.msk [vmem:[%s1670_s27 + $0x98] sm:$0xff] %vm1185_vm4, %v1051_v30  ;;  %1416 = vmatmul.msk.f32.gmra.mxu2 %vm779_vm3, %v739_v28  ;;  %v659_v22 = vpop.f32.mrf.mxu3 }
 0x1ae   : > { %v1053_v36 = vpop.f32.mrf.mxu1 }
 0x1af   : > { %v1054_v37 = vadd.f32 %v1661_v31, %v1053_v36 }
 0x1b1   : > { %1206 = vst.msk [vmem:[%s1670_s27 + $0xa0] sm:$0xff] %vm1185_vm4, %v1054_v37  ;;  %1417 = vmatmul.msk.f32.gmra.mxu2 %vm779_vm3, %v740_v35  ;;  %v662_v28 = vpop.f32.mrf.mxu3 }
 0x1b2   : > { %v663_v45 = vadd.f32 %v1584_v25, %v662_v28 }
 0x1b6   : > { %v1056_v42 = vpop.f32.mrf.mxu1 }
 0x1b7   : > { %v1057_v43 = vadd.f32 %v1661_v31, %v1056_v42 }
 0x1b9   : > { %1207 = vst.msk [vmem:[%s1670_s27 + $0xa8] sm:$0xff] %vm1185_vm4, %v1057_v43  ;;  %1418 = vmatmul.msk.f32.gmra.mxu2 %vm779_vm3, %v741_v41  ;;  %v665_v36 = vpop.f32.mrf.mxu3  ;;  %v660_v41 = vadd.f32 %v1584_v25, %v659_v22 }
 0x1ba   : > { %v666_v50 = vadd.f32 %v1584_v25, %v665_v36 }
 0x1bb   : > { %v753_v43 = vmax.f32 %v660_v41, 0.0 }
 0x1be   : > { %v1059_v48 = vpop.f32.mrf.mxu1 }
 0x1bf   : > { %v1060_v49 = vadd.f32 %v1661_v31, %v1059_v48  ;;  %v754_v48 = vmax.f32 %v663_v45, 0.0 }
 0x1c1   : > { %1208 = vst.msk [vmem:[%s1670_s27 + $0xb0] sm:$0xff] %vm1185_vm4, %v1060_v49  ;;  %1419 = vmatmul.msk.f32.gmra.mxu2 %vm779_vm3, %v742_v47  ;;  %v668_v40 = vpop.f32.mrf.mxu3 }
 0x1c6   : > { %v1062_v54 = vpop.f32.mrf.mxu1 }
 0x1c7   : > { %v1063_v55 = vadd.f32 %v1661_v31, %v1062_v54 }
 0x1c9   : > { %1209 = vst.msk [vmem:[%s1670_s27 + $0xb8] sm:$0xff] %vm1185_vm4, %v1063_v55  ;;  %1420 = vmatmul.msk.f32.gmra.mxu2 %vm779_vm3, %v743_v53  ;;  %v755_v53 = vmax.f32 %v666_v50, 0.0  ;;  %v669_v55 = vadd.f32 %v1584_v25, %v668_v40 }
 0x1cb   : > { %v671_v46 = vpop.f32.mrf.mxu3  ;;  %v756_v57 = vmax.f32 %v669_v55, 0.0 }
 0x1ce   : > { %v1065_v60 = vpop.f32.mrf.mxu1 }
 0x1cf   : > { %v1066_v61 = vadd.f32 %v1661_v31, %v1065_v60  ;;  %v672_v60 = vadd.f32 %v1584_v25, %v671_v46 }
 0x1d1   : > { %1210 = vst.msk [vmem:[%s1670_s27 + $0xc0] sm:$0xff] %vm1185_vm4, %v1066_v61  ;;  %1421 = vmatmul.msk.f32.gmra.mxu2 %vm779_vm3, %v744_v59  ;;  %v757_v62 = vmax.f32 %v672_v60, 0.0 }
 0x1d3   : > { %v674_v52 = vpop.f32.mrf.mxu3 }
 0x1d6   : > { %v1068_v2 = vpop.f32.mrf.mxu1 }
 0x1d7   : > { %v1069_v3 = vadd.f32 %v1661_v31, %v1068_v2 }
 0x1d9   : > { %1211 = vst.msk [vmem:[%s1670_s27 + $0xc8] sm:$0xff] %vm1185_vm4, %v1069_v3  ;;  %1422 = vmatmul.msk.f32.gmra.mxu2 %vm779_vm3, %v745_v1  ;;  %v675_v1 = vadd.f32 %v1584_v25, %v674_v52 }
 0x1db   : > { %v677_v59 = vpop.f32.mrf.mxu3  ;;  %v758_v3 = vmax.f32 %v675_v1, 0.0 }
 0x1dc   : > { %v678_v5 = vadd.f32 %v1584_v25, %v677_v59 }
 0x1de   : > { %v1071_v8 = vpop.f32.mrf.mxu1 }
 0x1df   : > { %v1072_v9 = vadd.f32 %v1661_v31, %v1071_v8  ;;  %v759_v8 = vmax.f32 %v678_v5, 0.0 }
 0x1e1   : > { %1212 = vst.msk [vmem:[%s1670_s27 + $0xd0] sm:$0xff] %vm1185_vm4, %v1072_v9  ;;  %1423 = vmatmul.msk.f32.gmra.mxu2 %vm779_vm3, %v746_v7 }
 0x1e3   : > { %v680_v0 = vpop.f32.mrf.mxu3 }
 0x1e4   : > { %v681_v10 = vadd.f32 %v1584_v25, %v680_v0 }
 0x1e6   : > { %v1074_v14 = vpop.f32.mrf.mxu1 }
 0x1e7   : > { %v1075_v15 = vadd.f32 %v1661_v31, %v1074_v14 }
 0x1e9   : > { %1213 = vst.msk [vmem:[%s1670_s27 + $0xd8] sm:$0xff] %vm1185_vm4, %v1075_v15  ;;  %1424 = vmatmul.msk.f32.gmra.mxu2 %vm779_vm3, %v747_v13  ;;  %v760_v13 = vmax.f32 %v681_v10, 0.0 }
 0x1eb   : > { %v683_v6 = vpop.f32.mrf.mxu3 }
 0x1ec   : > { %v684_v15 = vadd.f32 %v1584_v25, %v683_v6 }
 0x1ee   : > { %v1077_v19 = vpop.f32.mrf.mxu1  ;;  %v761_v17 = vmax.f32 %v684_v15, 0.0 }
 0x1ef   : > { %v1078_v20 = vadd.f32 %v1661_v31, %v1077_v19 }
 0x1f1   : > { %1214 = vst.msk [vmem:[%s1670_s27 + $0xe0] sm:$0xff] %vm1185_vm4, %v1078_v20  ;;  %1425 = vmatmul.msk.f32.gmra.mxu2 %vm779_vm3, %v748_v18 }
 0x1f3   : > { %v686_v12 = vpop.f32.mrf.mxu3 }
 0x1f4   : > { %v687_v20 = vadd.f32 %v1584_v25, %v686_v12 }
 0x1f6   : > { %v1080_v24 = vpop.f32.mrf.mxu1  ;;  %v762_v22 = vmax.f32 %v687_v20, 0.0 }
 0x1f7   : > { %v1081_v26 = vadd.f32 %v1661_v31, %v1080_v24 }
 0x1f9   : > { %1215 = vst.msk [vmem:[%s1670_s27 + $0xe8] sm:$0xff] %vm1185_vm4, %v1081_v26  ;;  %1426 = vmatmul.msk.f32.gmra.mxu2 %vm779_vm3, %v749_v23 }
 0x1fb   : > { %v689_v19 = vpop.f32.mrf.mxu3 }
 0x1fc   : > { %v690_v26 = vadd.f32 %v1584_v25, %v689_v19 }
 0x1fe   : > { %v1083_v30 = vpop.f32.mrf.mxu1  ;;  %v763_v28 = vmax.f32 %v690_v26, 0.0 }
 0x1ff   : > { %v1084_v32 = vadd.f32 %v1661_v31, %v1083_v30 }
 0x201   : > { %1216 = vst.msk [vmem:[%s1670_s27 + $0xf0] sm:$0xff] %vm1185_vm4, %v1084_v32  ;;  %1427 = vmatmul.msk.f32.gmra.mxu2 %vm779_vm3, %v750_v29 }
 0x203   : > { %v692_v24 = vpop.f32.mrf.mxu3 }
 0x204   : > { %v693_v30 = vadd.f32 %v1584_v25, %v692_v24 }
 0x206   : > { %v1086_v35 = vpop.f32.mrf.mxu1 }
 0x207   : > { %v1087_v37 = vadd.f32 %v1661_v31, %v1086_v35 }
 0x209   : > { %1217 = vst.msk [vmem:[%s1670_s27 + $0xf8] sm:$0xff] %vm1185_vm4, %v1087_v37  ;;  %1428 = vmatmul.msk.f32.gmra.mxu2 %vm779_vm3, %v751_v34  ;;  %v764_v34 = vmax.f32 %v693_v30, 0.0 }
 0x20b   : > { %v695_v32 = vpop.f32.mrf.mxu3 }
 0x20c   : > { %v696_v36 = vadd.f32 %v1584_v25, %v695_v32 }
 0x211   : > { %1429 = vmatmul.msk.f32.gmra.mxu2 %vm779_vm3, %v752_v39  ;;  %v765_v39 = vmax.f32 %v696_v36, 0.0 }
 0x213   : > { %v698_v38 = vpop.f32.mrf.mxu3 }
 0x214   : > { %v1089_v42 = vpop.f32.mrf.mxu2  ;;  %v699_v41 = vadd.f32 %v1584_v25, %v698_v38 }
 0x215   : > { %v1090_v44 = vadd.f32 %v1661_v31, %v1089_v42 }
 0x217   : > { %1218 = vst.msk [vmem:[%s1670_s27 + $0x100] sm:$0xff] %vm1185_vm4, %v1090_v44 }
 0x219   : > { %1430 = vmatmul.msk.f32.gmra.mxu2 %vm779_vm3, %v753_v43  ;;  %v766_v43 = vmax.f32 %v699_v41, 0.0 }
 0x21b   : > { %v701_v45 = vpop.f32.mrf.mxu3 }
 0x21c   : > { %v1092_v47 = vpop.f32.mrf.mxu2  ;;  %v702_v46 = vadd.f32 %v1584_v25, %v701_v45 }
 0x21d   : > { %v1093_v49 = vadd.f32 %v1661_v31, %v1092_v47 }
 0x21f   : > { %1219 = vst.msk [vmem:[%s1670_s27 + $0x108] sm:$0xff] %vm1185_vm4, %v1093_v49 }
 0x221   : > { %1431 = vmatmul.msk.f32.gmra.mxu2 %vm779_vm3, %v754_v48  ;;  %v767_v48 = vmax.f32 %v702_v46, 0.0 }
 0x224   : > { %v1095_v51 = vpop.f32.mrf.mxu2 }
 0x225   : > { %v1096_v54 = vadd.f32 %v1661_v31, %v1095_v51 }
 0x227   : > { %1220 = vst.msk [vmem:[%s1670_s27 + $0x110] sm:$0xff] %vm1185_vm4, %v1096_v54 }
 0x229   : > { %1432 = vmatmul.msk.f32.gmra.mxu2 %vm779_vm3, %v755_v53 }
 0x22c   : > { %v1098_v56 = vpop.f32.mrf.mxu2 }
 0x22d   : > { %v1099_v58 = vadd.f32 %v1661_v31, %v1098_v56 }
 0x22f   : > { %1221 = vst.msk [vmem:[%s1670_s27 + $0x118] sm:$0xff] %vm1185_vm4, %v1099_v58 }
 0x231   : > { %1433 = vmatmul.msk.f32.gmra.mxu2 %vm779_vm3, %v756_v57 }
 0x234   : > { %v1101_v61 = vpop.f32.mrf.mxu2 }
 0x235   : > { %v1102_v63 = vadd.f32 %v1661_v31, %v1101_v61 }
 0x237   : > { %1222 = vst.msk [vmem:[%s1670_s27 + $0x120] sm:$0xff] %vm1185_vm4, %v1102_v63 }
 0x239   : > { %1434 = vmatmul.msk.f32.gmra.mxu2 %vm779_vm3, %v757_v62 }
 0x23c   : > { %v1104_v2 = vpop.f32.mrf.mxu2 }
 0x23d   : > { %v1105_v4 = vadd.f32 %v1661_v31, %v1104_v2 }
 0x23f   : > { %1223 = vst.msk [vmem:[%s1670_s27 + $0x128] sm:$0xff] %vm1185_vm4, %v1105_v4 }
 0x241   : > { %1435 = vmatmul.msk.f32.gmra.mxu2 %vm779_vm3, %v758_v3 }
 0x244   : > { %v1107_v7 = vpop.f32.mrf.mxu2 }
 0x245   : > { %v1108_v9 = vadd.f32 %v1661_v31, %v1107_v7 }
 0x247   : > { %1224 = vst.msk [vmem:[%s1670_s27 + $0x130] sm:$0xff] %vm1185_vm4, %v1108_v9 }
 0x249   : > { %1436 = vmatmul.msk.f32.gmra.mxu2 %vm779_vm3, %v759_v8 }
 0x24c   : > { %v1110_v11 = vpop.f32.mrf.mxu2 }
 0x24d   : > { %v1111_v14 = vadd.f32 %v1661_v31, %v1110_v11 }
 0x24f   : > { %1225 = vst.msk [vmem:[%s1670_s27 + $0x138] sm:$0xff] %vm1185_vm4, %v1111_v14 }
 0x251   : > { %1437 = vmatmul.msk.f32.gmra.mxu2 %vm779_vm3, %v760_v13 }
 0x254   : > { %v1113_v16 = vpop.f32.mrf.mxu2 }
 0x255   : > { %v1114_v18 = vadd.f32 %v1661_v31, %v1113_v16 }
 0x257   : > { %1226 = vst.msk [vmem:[%s1670_s27 + $0x140] sm:$0xff] %vm1185_vm4, %v1114_v18 }
 0x259   : > { %1438 = vmatmul.msk.f32.gmra.mxu2 %vm779_vm3, %v761_v17 }
 0x25c   : > { %v1116_v21 = vpop.f32.mrf.mxu2 }
 0x25d   : > { %v1117_v23 = vadd.f32 %v1661_v31, %v1116_v21 }
 0x25f   : > { %1227 = vst.msk [vmem:[%s1670_s27 + $0x148] sm:$0xff] %vm1185_vm4, %v1117_v23 }
 0x261   : > { %1439 = vmatmul.msk.f32.gmra.mxu2 %vm779_vm3, %v762_v22 }
 0x264   : > { %v1119_v27 = vpop.f32.mrf.mxu2 }
 0x265   : > { %v1120_v29 = vadd.f32 %v1661_v31, %v1119_v27 }
 0x267   : > { %1228 = vst.msk [vmem:[%s1670_s27 + $0x150] sm:$0xff] %vm1185_vm4, %v1120_v29 }
 0x269   : > { %1440 = vmatmul.msk.f32.gmra.mxu2 %vm779_vm3, %v763_v28 }
 0x26c   : > { %v1122_v33 = vpop.f32.mrf.mxu2 }
 0x26d   : > { %v1123_v35 = vadd.f32 %v1661_v31, %v1122_v33 }
 0x26f   : > { %1229 = vst.msk [vmem:[%s1670_s27 + $0x158] sm:$0xff] %vm1185_vm4, %v1123_v35 }
 0x271   : > { %1441 = vmatmul.msk.f32.gmra.mxu2 %vm779_vm3, %v764_v34 }
 0x274   : > { %v1125_v37 = vpop.f32.mrf.mxu2 }
 0x275   : > { %v1126_v40 = vadd.f32 %v1661_v31, %v1125_v37 }
 0x277   : > { %1230 = vst.msk [vmem:[%s1670_s27 + $0x160] sm:$0xff] %vm1185_vm4, %v1126_v40 }
 0x279   : > { %1442 = vmatmul.msk.f32.gmra.mxu2 %vm779_vm3, %v765_v39 }
 0x27c   : > { %v1128_v42 = vpop.f32.mrf.mxu2 }
 0x27d   : > { %v1129_v44 = vadd.f32 %v1661_v31, %v1128_v42 }
 0x27f   : > { %1231 = vst.msk [vmem:[%s1670_s27 + $0x168] sm:$0xff] %vm1185_vm4, %v1129_v44 }
 0x281   : > { %1443 = vmatmul.msk.f32.gmra.mxu2 %vm779_vm3, %v766_v43 }
 0x284   : > { %v1131_v47 = vpop.f32.mrf.mxu2 }
 0x285   : > { %v1132_v49 = vadd.f32 %v1661_v31, %v1131_v47 }
 0x287   : > { %1232 = vst.msk [vmem:[%s1670_s27 + $0x170] sm:$0xff] %vm1185_vm4, %v1132_v49 }
 0x289   : > { %1444 = vmatmul.msk.f32.gmra.mxu2 %vm779_vm3, %v767_v48 }
 0x28c   : > { %v1134_v50 = vpop.f32.mrf.mxu2 }
 0x28d   : > { %v1135_v51 = vadd.f32 %v1661_v31, %v1134_v50 }
 0x28f   : > { %1233 = vst.msk [vmem:[%s1670_s27 + $0x178] sm:$0xff] %vm1185_vm4, %v1135_v51 }
 0x294   : > { %v1137_v52 = vpop.f32.mrf.mxu2 }
 0x295   : > { %v1138_v53 = vadd.f32 %v1661_v31, %v1137_v52 }
 0x297   : > { %1234 = vst.msk [vmem:[%s1670_s27 + $0x180] sm:$0xff] %vm1185_vm4, %v1138_v53 }
 0x29c   : > { %v1140_v25 = vpop.f32.mrf.mxu2 }
 0x29d   : > { %v1141_v54 = vadd.f32 %v1661_v31, %v1140_v25 }
 0x29f   : > { %1235 = vst.msk [vmem:[%s1670_s27 + $0x188] sm:$0xff] %vm1185_vm4, %v1141_v54 }
 0x2a4   : > { %v1143_v55 = vpop.f32.mrf.mxu2 }
 0x2a5   : > { %v1144_v56 = vadd.f32 %v1661_v31, %v1143_v55 }
 0x2a7   : > { %1236 = vst.msk [vmem:[%s1670_s27 + $0x190] sm:$0xff] %vm1185_vm4, %v1144_v56 }
 0x2ac   : > { %v1146_v57 = vpop.f32.mrf.mxu2 }
 0x2ad   : > { %v1147_v58 = vadd.f32 %v1661_v31, %v1146_v57 }
 0x2af   : > { %1237 = vst.msk [vmem:[%s1670_s27 + $0x198] sm:$0xff] %vm1185_vm4, %v1147_v58 }
 0x2b4   : > { %v1149_v59 = vpop.f32.mrf.mxu2 }
 0x2b5   : > { %v1150_v60 = vadd.f32 %v1661_v31, %v1149_v59 }
 0x2b7   : > { %1238 = vst.msk [vmem:[%s1670_s27 + $0x1a0] sm:$0xff] %vm1185_vm4, %v1150_v60 }
 0x2bc   : > { %v1152_v61 = vpop.f32.mrf.mxu2 }
 0x2bd   : > { %v1153_v62 = vadd.f32 %v1661_v31, %v1152_v61 }
 0x2bf   : > { %1239 = vst.msk [vmem:[%s1670_s27 + $0x1a8] sm:$0xff] %vm1185_vm4, %v1153_v62 }
 0x2c4   : > { %v1155_v63 = vpop.f32.mrf.mxu2 }
 0x2c5   : > { %v1156_v0 = vadd.f32 %v1661_v31, %v1155_v63 }
 0x2c7   : > { %1240 = vst.msk [vmem:[%s1670_s27 + $0x1b0] sm:$0xff] %vm1185_vm4, %v1156_v0 }
 0x2cc   : > { %v1158_v1 = vpop.f32.mrf.mxu2 }
 0x2cd   : > { %v1159_v2 = vadd.f32 %v1661_v31, %v1158_v1 }
 0x2cf   : > { %1241 = vst.msk [vmem:[%s1670_s27 + $0x1b8] sm:$0xff] %vm1185_vm4, %v1159_v2 }
 0x2d4   : > { %v1161_v3 = vpop.f32.mrf.mxu2 }
 0x2d5   : > { %v1162_v4 = vadd.f32 %v1661_v31, %v1161_v3 }
 0x2d7   : > { %1242 = vst.msk [vmem:[%s1670_s27 + $0x1c0] sm:$0xff] %vm1185_vm4, %v1162_v4 }
 0x2dc   : > { %v1164_v5 = vpop.f32.mrf.mxu2 }
 0x2dd   : > { %v1165_v6 = vadd.f32 %v1661_v31, %v1164_v5 }
 0x2df   : > { %1243 = vst.msk [vmem:[%s1670_s27 + $0x1c8] sm:$0xff] %vm1185_vm4, %v1165_v6 }
 0x2e4   : > { %v1167_v7 = vpop.f32.mrf.mxu2 }
 0x2e5   : > { %v1168_v8 = vadd.f32 %v1661_v31, %v1167_v7 }
 0x2e7   : > { %1244 = vst.msk [vmem:[%s1670_s27 + $0x1d0] sm:$0xff] %vm1185_vm4, %v1168_v8 }
 0x2ec   : > { %v1170_v9 = vpop.f32.mrf.mxu2 }
 0x2ed   : > { %v1171_v10 = vadd.f32 %v1661_v31, %v1170_v9 }
 0x2ef   : > { %1245 = vst.msk [vmem:[%s1670_s27 + $0x1d8] sm:$0xff] %vm1185_vm4, %v1171_v10 }
 0x2f4   : > { %v1173_v11 = vpop.f32.mrf.mxu2 }
 0x2f5   : > { %v1174_v12 = vadd.f32 %v1661_v31, %v1173_v11 }
 0x2f7   : > { %1246 = vst.msk [vmem:[%s1670_s27 + $0x1e0] sm:$0xff] %vm1185_vm4, %v1174_v12 }
 0x2fc   : > { %v1176_v13 = vpop.f32.mrf.mxu2 }
 0x2fd   : > { %v1177_v14 = vadd.f32 %v1661_v31, %v1176_v13 }
 0x2ff   : > { %1247 = vst.msk [vmem:[%s1670_s27 + $0x1e8] sm:$0xff] %vm1185_vm4, %v1177_v14 }
 0x304   : > { %v1179_v15 = vpop.f32.mrf.mxu2 }
 0x305   : > { %v1180_v16 = vadd.f32 %v1661_v31, %v1179_v15 }
 0x307   : > { %1248 = vst.msk [vmem:[%s1670_s27 + $0x1f0] sm:$0xff] %vm1185_vm4, %v1180_v16 }
 0x30c   : > { %v1182_v17 = vpop.f32.mrf.mxu2 }
 0x30d   : > { %v1183_v18 = vadd.f32 %v1661_v31, %v1182_v17 }
 0x30f   : > { %1249 = vst.msk [vmem:[%s1670_s27 + $0x1f8] sm:$0xff] %vm1185_vm4, %v1183_v18 }
 0x310 PF: > { %s15_s18 = sadd.s32 1, %s1472_s18  }
 0x311   : > { %p12_p4 = scmp.ge.s32.totalorder %s15_s18, 4  }
 0x313   :  { %14 = sbr.rel (!%p12_p4) target bundleno = 1 (0x1), region = 70 }

</bundles_post_ra>
